<compile_context>
chip_gen: v7x
topology: tpu7x:2x2x1
jax: 0.10.0
libtpu: 0.0.40
codegen_flags: <defaults>
</compile_context>

<pallas_src>
import functools

import jax
import jax.numpy as jnp
from jax.experimental import pallas as pl
from jax.experimental.pallas import tpu as pltpu


def _round_up(x: int, m: int) -> int:
    return ((x + m - 1) // m) * m


def _vmem_capacity_bytes() -> int:
    """Physical per-core VMEM (128 MiB v5e/v6e, 64 MiB v7x)."""
    try:
        return int(pltpu.get_tpu_info().vmem_capacity_bytes)
    except Exception:
        return 64 << 20  # conservative fallback (v7x per-core)


def _batch_tile_cap() -> int:
    """Max batch-tile rows: 128 saturates v5e's 128x128 MXU; 256 for v6e/v7x."""
    try:
        kind = jax.devices()[0].device_kind.lower()
        if "v5" in kind and ("lite" in kind or "v5e" in kind):
            return 128
    except Exception:
        pass
    return 256


def _choose_tb(batch: int, cap: int):
    """Pick a batch tile (multiple of 16 for bf16 sublane packing) that
    minimizes padding, preferring >=2 grid steps (v7x dual-TC sharding)."""
    hi = min(cap, _round_up(batch, 16))
    best_key, best = None, (16, _round_up(batch, 16))
    for tb in range(16, hi + 1, 16):
        b_pad = _round_up(batch, tb)
        steps = b_pad // tb
        key = (b_pad - batch, 0 if steps >= 2 else 1, -tb)
        if best_key is None or key < best_key:
            best_key, best = key, (tb, b_pad)
    return best  # (tb, b_pad)


def _resident_spec(shape):
    """Full-array, constant-index block: fetched once, kept resident.

    Single-buffered so invariant weights don't pay for a useless second
    pipeline buffer."""
    try:
        return pl.BlockSpec(shape, lambda i: (0, 0),
                            pipeline_mode=pl.Buffered(1))
    except TypeError:  # older jax without pipeline_mode: default buffering
        return pl.BlockSpec(shape, lambda i: (0, 0))


def _fused_vmem_need(tb, weights, biases, x_itemsize=2, out_itemsize=4):
    """Approximate VMEM bytes needed by the fully fused kernel."""
    din_pad = weights[0].shape[0]
    c_pad = weights[-1].shape[1]
    max_h = max(w.shape[1] for w in weights)
    w_bytes = sum(int(w.size) * w.dtype.itemsize for w in weights)  # 1-buffered
    b_bytes = sum(int(b.size) * b.dtype.itemsize for b in biases)
    x_bytes = 2 * tb * din_pad * x_itemsize      # double-buffered input tile
    o_bytes = 2 * tb * c_pad * out_itemsize      # double-buffered output tile
    act_bytes = 2 * tb * max_h * 4               # in-flight f32 layer temporaries
    return w_bytes + b_bytes + x_bytes + o_bytes + act_bytes


# ----------------------------------------------------------------------------
# Fast path: whole MLP fused in one pallas_call (weights resident in VMEM).
# ----------------------------------------------------------------------------
def _fused_mlp_kernel(*refs, num_layers: int):
    """refs: x_ref, (w_ref, b_ref) * num_layers, o_ref
      x_ref: (TB, Din_pad) bf16
      w_ref: (Dprev_pad, Dnext_pad) bf16  (pre-transposed vs torch (out, in))
      b_ref: (1, Dnext_pad) f32
      o_ref: (TB, C_pad) f32
    """
    x_ref = refs[0]
    o_ref = refs[1 + 2 * num_layers]

    h = x_ref[...]  # bf16 activation, stays on-chip across layers
    for li in range(num_layers):
        w_ref = refs[1 + 2 * li]
        b_ref = refs[2 + 2 * li]
        y = jnp.dot(h, w_ref[...], preferred_element_type=jnp.float32)
        y = y + b_ref[...]  # f32 epilogue
        if li < num_layers - 1:
            h = jnp.maximum(y, 0.0).astype(jnp.bfloat16)  # hidden: ReLU
        else:
            o_ref[...] = y  # final Linear: no activation


def fused_mlp_forward(x_pad, weights, biases, *, tb: int):
    b_pad, din_pad = x_pad.shape
    num_layers = len(weights)
    c_pad = weights[-1].shape[1]

    in_specs = [pl.BlockSpec((tb, din_pad), lambda i: (i, 0))]
    flat_inputs = [x_pad]
    for w, b in zip(weights, biases):
        in_specs.append(_resident_spec(w.shape))
        in_specs.append(_resident_spec(b.shape))
        flat_inputs.append(w)
        flat_inputs.append(b)

    phys = _vmem_capacity_bytes()
    need = _fused_vmem_need(tb, weights, biases)
    vmem_limit = int(min(phys, max(need + (4 << 20), 32 << 20)))

    flops = 2 * b_pad * sum(int(w.shape[0]) * int(w.shape[1]) for w in weights)
    bytes_accessed = (int(x_pad.size) * x_pad.dtype.itemsize
                      + sum(int(w.size) * w.dtype.itemsize for w in weights)
                      + sum(int(b.size) * b.dtype.itemsize for b in biases)
                      + b_pad * c_pad * 4)

    kernel = functools.partial(_fused_mlp_kernel, num_layers=num_layers)
    return pl.pallas_call(
        kernel,
        out_shape=jax.ShapeDtypeStruct((b_pad, c_pad), jnp.float32),
        grid=(b_pad // tb,),
        in_specs=in_specs,
        out_specs=pl.BlockSpec((tb, c_pad), lambda i: (i, 0)),
        compiler_params=pltpu.CompilerParams(
            dimension_semantics=("parallel",),
            vmem_limit_bytes=vmem_limit),
        cost_estimate=pl.CostEstimate(flops=flops, transcendentals=0,
                                      bytes_accessed=bytes_accessed),
    )(*flat_inputs)


# ----------------------------------------------------------------------------
# Fallback path: per-layer K-tiled matmul + bias (+ReLU) with f32 accumulator.
# Used when the resident-weight footprint exceeds the VMEM budget.
# ----------------------------------------------------------------------------
def _tiled_linear_kernel(x_ref, w_ref, b_ref, o_ref, acc_ref, *, relu: bool):
    @pl.when(pl.program_id(2) == 0)
    def _():
        acc_ref[...] = jnp.zeros_like(acc_ref)

    acc_ref[...] += jnp.dot(x_ref[...], w_ref[...],
                            preferred_element_type=jnp.float32)

    @pl.when(pl.program_id(2) == pl.num_programs(2) - 1)
    def _():
        y = acc_ref[...] + b_ref[...]
        if relu:
            y = jnp.maximum(y, 0.0)
        o_ref[...] = y.astype(o_ref.dtype)


def _largest_divisor_tile(dim: int, cap: int, step: int = 128) -> int:
    best = step
    c = step
    while c <= min(cap, dim):
        if dim % c == 0:
            best = c
        c += step
    return best


def tiled_linear(x, w, b, *, relu: bool, out_dtype, tm: int):
    M, K = x.shape
    _, N = w.shape
    tm = min(tm, M)
    tn = _largest_divisor_tile(N, 256)
    tk = _largest_divisor_tile(K, 512)
    kernel = functools.partial(_tiled_linear_kernel, relu=relu)
    return pl.pallas_call(
        kernel,
        out_shape=jax.ShapeDtypeStruct((M, N), out_dtype),
        grid=(M // tm, N // tn, K // tk),
        in_specs=[
            pl.BlockSpec((tm, tk), lambda i, j, k: (i, k)),
            pl.BlockSpec((tk, tn), lambda i, j, k: (k, j)),
            pl.BlockSpec((1, tn), lambda i, j, k: (0, j)),
        ],
        out_specs=pl.BlockSpec((tm, tn), lambda i, j, k: (i, j)),
        scratch_shapes=[pltpu.VMEM((tm, tn), jnp.float32)],
        compiler_params=pltpu.CompilerParams(
            dimension_semantics=("parallel", "parallel", "arbitrary")),
    )(x, w, b)


def tiled_mlp_forward(x_pad, weights, biases, *, tb: int):
    h = x_pad
    n = len(weights)
    for li, (w, b) in enumerate(zip(weights, biases)):
        last = li == n - 1
        h = tiled_linear(h, w, b, relu=not last,
                         out_dtype=jnp.float32 if last else jnp.bfloat16,
                         tm=tb)
    return h


# ----------------------------------------------------------------------------
# Wrapper matching the PyTorch MLP forward semantics.
# ----------------------------------------------------------------------------
class PallasMLP:
    """JAX/Pallas re-implementation of the PyTorch MLP forward pass."""

    def __init__(self, input_size, hidden_size, num_classes, hidden_count=1,
                 key=None):
        # NOTE: the torch module takes an `initializer` arg but never applies
        # it (weights keep nn.Linear's default init); we use a fixed PRNG.
        if key is None:
            key = jax.random.PRNGKey(0)
        self.input_size = input_size
        self.num_classes = num_classes

        dims = [input_size] + [hidden_size] * hidden_count + [num_classes]
        pad_dims = [_round_up(d, 128) for d in dims]
        self.din_pad = pad_dims[0]
        self.c_pad = pad_dims[-1]

        self.params_f32 = []   # unpadded f32 masters (for reference checks)
        self.weights = []      # padded bf16 (Din_pad, Dout_pad)
        self.biases = []       # padded f32 (1, Dout_pad)
        for i in range(len(dims) - 1):
            key, kw, kb = jax.random.split(key, 3)
            w = jax.random.normal(kw, (dims[i], dims[i + 1]), jnp.float32) * 0.02
            b = jax.random.normal(kb, (dims[i + 1],), jnp.float32) * 0.02
            self.params_f32.append((w, b))

            w_pad = jnp.zeros((pad_dims[i], pad_dims[i + 1]), jnp.float32)
            w_pad = w_pad.at[:dims[i], :dims[i + 1]].set(w)
            b_pad = jnp.zeros((1, pad_dims[i + 1]), jnp.float32)
            b_pad = b_pad.at[0, :dims[i + 1]].set(b)
            self.weights.append(w_pad.astype(jnp.bfloat16))
            self.biases.append(b_pad)

    def __call__(self, x, force_tiled: bool = False):
        B = x.shape[0]
        # torch: x.view(B, -1); cast straight to bf16 (no f32 intermediate).
        x_bf = x.reshape(B, -1).astype(jnp.bfloat16)

        tb, b_pad = _choose_tb(B, _batch_tile_cap())

        # Pad only what is actually ragged.
        pad_b = b_pad - B
        pad_f = self.din_pad - self.input_size
        if pad_b or pad_f:
            x_bf = jnp.pad(x_bf, ((0, pad_b), (0, pad_f)))

        phys = _vmem_capacity_bytes()
        need = _fused_vmem_need(tb, self.weights, self.biases)
        use_fused = (not force_tiled) and (need <= int(0.9 * phys))

        if use_fused:
            out_pad = fused_mlp_forward(x_bf, self.weights, self.biases, tb=tb)
        else:
            out_pad = tiled_mlp_forward(x_bf, self.weights, self.biases, tb=tb)
        return out_pad[:B, :self.num_classes]


if __name__ == "__main__":
    key = jax.random.PRNGKey(0)
    k_in, k_params = jax.random.split(key)

    # Small, shape-consistent example: NCHW input flattened to D = 4*16*16.
    B, C, H, W = 2, 4, 16, 16
    input_size = C * H * W
    hidden_size = 32
    num_classes = 10
    hidden_count = 2

    x = jax.random.normal(k_in, (B, C, H, W), jnp.float32)

    model = PallasMLP(input_size, hidden_size, num_classes,
                      hidden_count=hidden_count, key=k_params)

    # Fused fast path.
    out = jax.block_until_ready(model(x))
    assert out.shape == (B, num_classes)

    # Reference 1: emulate the kernel's bf16-matmul / f32-accumulate path.
    h = x.reshape(B, -1).astype(jnp.bfloat16)
    n_layers = len(model.params_f32)
    for li, (w, b) in enumerate(model.params_f32):
        y = jnp.dot(h, w.astype(jnp.bfloat16),
                    preferred_element_type=jnp.float32) + b
        if li < n_layers - 1:
            h = jnp.maximum(y, 0.0).astype(jnp.bfloat16)
    ref_bf16 = y
    assert jnp.allclose(out, ref_bf16, atol=2e-3, rtol=2e-3)

    # Reference 2: pure f32 forward pass (loose tol due to bf16 inputs).
    rf = x.reshape(B, -1)
    for li, (w, b) in enumerate(model.params_f32):
        rf = rf @ w + b
        if li < n_layers - 1:
            rf = jnp.maximum(rf, 0.0)
    assert jnp.allclose(out, rf, atol=5e-2, rtol=5e-2)

    # Also exercise the K-tiled fallback path (used when weights exceed VMEM).
    out_tiled = jax.block_until_ready(model(x, force_tiled=True))
    assert out_tiled.shape == (B, num_classes)
    assert jnp.allclose(out_tiled, ref_bf16, atol=2e-3, rtol=2e-3)
    assert jnp.allclose(out_tiled, out, atol=2e-3, rtol=2e-3)

    print("KERNEL_OK")
</pallas_src>

<mosaic_0001>
module attributes {stable_mosaic.version = 11 : i64} {
  func.func @_fused_mlp_kernel(%arg0: i32, %arg1: memref<16x1024xbf16, #tpu.memory_space<vmem>>, %arg2: memref<1024x128xbf16, #tpu.memory_space<vmem>>, %arg3: memref<1x128xf32, #tpu.memory_space<vmem>>, %arg4: memref<128x128xbf16, #tpu.memory_space<vmem>>, %arg5: memref<1x128xf32, #tpu.memory_space<vmem>>, %arg6: memref<128x128xbf16, #tpu.memory_space<vmem>>, %arg7: memref<1x128xf32, #tpu.memory_space<vmem>>, %arg8: memref<16x128xf32, #tpu.memory_space<vmem>>) attributes {dimension_semantics = [#tpu.dimension_semantics<parallel>], iteration_bounds = array<i64: 1>, scalar_prefetch = 0 : i64, scratch_operands = 0 : i64, tpu.core_type = #tpu.core_type<tc>, window_params = [{transform_indices = @transform_0, window_bounds = array<i64: 16, 1024>}, {pipeline_mode = #tpu.pipeline_mode<synchronous>, transform_indices = @transform_1, window_bounds = array<i64: 1024, 128>}, {pipeline_mode = #tpu.pipeline_mode<synchronous>, transform_indices = @transform_2, window_bounds = array<i64: 1, 128>}, {pipeline_mode = #tpu.pipeline_mode<synchronous>, transform_indices = @transform_3, window_bounds = array<i64: 128, 128>}, {pipeline_mode = #tpu.pipeline_mode<synchronous>, transform_indices = @transform_4, window_bounds = array<i64: 1, 128>}, {pipeline_mode = #tpu.pipeline_mode<synchronous>, transform_indices = @transform_5, window_bounds = array<i64: 128, 128>}, {pipeline_mode = #tpu.pipeline_mode<synchronous>, transform_indices = @transform_6, window_bounds = array<i64: 1, 128>}, {transform_indices = @transform_7, window_bounds = array<i64: 16, 128>}]} {
    %c0 = arith.constant 0 : index
    %c0_0 = arith.constant 0 : index
    %0 = vector.load %arg1[%c0, %c0_0] : memref<16x1024xbf16, #tpu.memory_space<vmem>>, vector<16x1024xbf16>
    %c0_1 = arith.constant 0 : index
    %c0_2 = arith.constant 0 : index
    %1 = vector.load %arg2[%c0_1, %c0_2] : memref<1024x128xbf16, #tpu.memory_space<vmem>>, vector<1024x128xbf16>
    %cst = arith.constant dense<0.000000e+00> : vector<16x128xf32>
    %2 = tpu.matmul %0, %1, %cst {dimension_numbers = #tpu.dot_dimension_numbers<[1], [0], [0], [1], [0, 0, 1, 1], [], []>} : vector<16x1024xbf16>, vector<1024x128xbf16>, vector<16x128xf32> -> vector<16x128xf32>
    %c0_3 = arith.constant 0 : index
    %c0_4 = arith.constant 0 : index
    %3 = vector.load %arg3[%c0_3, %c0_4] : memref<1x128xf32, #tpu.memory_space<vmem>>, vector<1x128xf32>
    %4 = vector.broadcast %3 : vector<1x128xf32> to vector<16x128xf32>
    %5 = arith.addf %2, %4 : vector<16x128xf32>
    %cst_5 = arith.constant 0.000000e+00 : f32
    %6 = vector.broadcast %cst_5 : f32 to vector<16x128xf32>
    %7 = arith.maximumf %5, %6 : vector<16x128xf32>
    %8 = arith.truncf %7 : vector<16x128xf32> to vector<16x128xbf16>
    %c0_6 = arith.constant 0 : index
    %c0_7 = arith.constant 0 : index
    %9 = vector.load %arg4[%c0_6, %c0_7] : memref<128x128xbf16, #tpu.memory_space<vmem>>, vector<128x128xbf16>
    %cst_8 = arith.constant dense<0.000000e+00> : vector<16x128xf32>
    %10 = tpu.matmul %8, %9, %cst_8 {dimension_numbers = #tpu.dot_dimension_numbers<[1], [0], [0], [1], [0, 0, 1, 1], [], []>} : vector<16x128xbf16>, vector<128x128xbf16>, vector<16x128xf32> -> vector<16x128xf32>
    %c0_9 = arith.constant 0 : index
    %c0_10 = arith.constant 0 : index
    %11 = vector.load %arg5[%c0_9, %c0_10] : memref<1x128xf32, #tpu.memory_space<vmem>>, vector<1x128xf32>
    %12 = vector.broadcast %11 : vector<1x128xf32> to vector<16x128xf32>
    %13 = arith.addf %10, %12 : vector<16x128xf32>
    %cst_11 = arith.constant 0.000000e+00 : f32
    %14 = vector.broadcast %cst_11 : f32 to vector<16x128xf32>
    %15 = arith.maximumf %13, %14 : vector<16x128xf32>
    %16 = arith.truncf %15 : vector<16x128xf32> to vector<16x128xbf16>
    %c0_12 = arith.constant 0 : index
    %c0_13 = arith.constant 0 : index
    %17 = vector.load %arg6[%c0_12, %c0_13] : memref<128x128xbf16, #tpu.memory_space<vmem>>, vector<128x128xbf16>
    %cst_14 = arith.constant dense<0.000000e+00> : vector<16x128xf32>
    %18 = tpu.matmul %16, %17, %cst_14 {dimension_numbers = #tpu.dot_dimension_numbers<[1], [0], [0], [1], [0, 0, 1, 1], [], []>} : vector<16x128xbf16>, vector<128x128xbf16>, vector<16x128xf32> -> vector<16x128xf32>
    %c0_15 = arith.constant 0 : index
    %c0_16 = arith.constant 0 : index
    %19 = vector.load %arg7[%c0_15, %c0_16] : memref<1x128xf32, #tpu.memory_space<vmem>>, vector<1x128xf32>
    %20 = vector.broadcast %19 : vector<1x128xf32> to vector<16x128xf32>
    %21 = arith.addf %18, %20 : vector<16x128xf32>
    %c0_17 = arith.constant 0 : index
    %c0_18 = arith.constant 0 : index
    %22 = vector.load %arg8[%c0_17, %c0_18] : memref<16x128xf32, #tpu.memory_space<vmem>>, vector<16x128xf32>
    tpu.vector_store %arg8[%c0_17, %c0_18], %21 {strides = array<i32>} : memref<16x128xf32, #tpu.memory_space<vmem>>, vector<16x128xf32>,
    return
  }
  func.func @transform_0(%arg0: i32) -> (i32, i32) {
    %c0_i32 = arith.constant 0 : i32
    %c0_i32_0 = arith.constant 0 : i32
    return %arg0, %c0_i32 : i32, i32
  }
  func.func @transform_1(%arg0: i32) -> (i32, i32) {
    %c0_i32 = arith.constant 0 : i32
    %c0_i32_0 = arith.constant 0 : i32
    %c0_i32_1 = arith.constant 0 : i32
    return %c0_i32, %c0_i32_0 : i32, i32
  }
  func.func @transform_2(%arg0: i32) -> (i32, i32) {
    %c0_i32 = arith.constant 0 : i32
    %c0_i32_0 = arith.constant 0 : i32
    %c0_i32_1 = arith.constant 0 : i32
    return %c0_i32, %c0_i32_0 : i32, i32
  }
  func.func @transform_3(%arg0: i32) -> (i32, i32) {
    %c0_i32 = arith.constant 0 : i32
    %c0_i32_0 = arith.constant 0 : i32
    %c0_i32_1 = arith.constant 0 : i32
    return %c0_i32, %c0_i32_0 : i32, i32
  }
  func.func @transform_4(%arg0: i32) -> (i32, i32) {
    %c0_i32 = arith.constant 0 : i32
    %c0_i32_0 = arith.constant 0 : i32
    %c0_i32_1 = arith.constant 0 : i32
    return %c0_i32, %c0_i32_0 : i32, i32
  }
  func.func @transform_5(%arg0: i32) -> (i32, i32) {
    %c0_i32 = arith.constant 0 : i32
    %c0_i32_0 = arith.constant 0 : i32
    %c0_i32_1 = arith.constant 0 : i32
    return %c0_i32, %c0_i32_0 : i32, i32
  }
  func.func @transform_6(%arg0: i32) -> (i32, i32) {
    %c0_i32 = arith.constant 0 : i32
    %c0_i32_0 = arith.constant 0 : i32
    %c0_i32_1 = arith.constant 0 : i32
    return %c0_i32, %c0_i32_0 : i32, i32
  }
  func.func @transform_7(%arg0: i32) -> (i32, i32) {
    %c0_i32 = arith.constant 0 : i32
    %c0_i32_0 = arith.constant 0 : i32
    return %arg0, %c0_i32 : i32, i32
  }
}

</mosaic_0001>

<bundles_post_ra>
// kernel: tpu_custom_call.1
= control target key start
LH: loop header
LB: loop body
LE: loop exit
PB: predicated region body
PF: predicated region fallthrough
CT: control target
= control target key end

     0   :  { %12 = vsyncpa [#allocation3], 0  ;;  %s1669_s0 = inlined_call_operand.hbm [shape: bf16[16,1024], index: 0, kind: input, shape index: {}]   ;;  %s1670_s1 = inlined_call_operand.hbm [shape: bf16[1024,128], index: 1, kind: input, shape index: {}]   ;;  %s1671_s2 = inlined_call_operand.vmem [shape: f32[1,128], index: 2, kind: input, shape index: {}]   ;;  %s1672_s3 = inlined_call_operand.hbm [shape: bf16[128,128], index: 3, kind: input, shape index: {}]   ;;  %s1673_s4 = inlined_call_operand.vmem [shape: f32[1,128], index: 4, kind: input, shape index: {}]   ;;  %s1674_s5 = inlined_call_operand.hbm [shape: bf16[128,128], index: 5, kind: input, shape index: {}]   ;;  %s1675_s6 = inlined_call_operand.vmem [shape: f32[1,128], index: 6, kind: input, shape index: {}]   ;;  %s1676_s7 = inlined_call_operand.hbm [shape: f32[16,128], index: 7, kind: output, shape index: {}]  }
   0x1   :  { %13 = vsyncpa [#allocation6], 0 }
   0x2   :  { %14 = vsyncpa [#allocation9], 0 }
   0x3   :  { %15 = vsyncpa [#allocation4], 0  ;;  %s1513_s24 = smov [#allocation5]   ;;  %s1395_s28 = scalar_lea.hbm %s1670_s1, 8192 }
   0x4   :  { %s33_s25 = sshll.u32 %s1513_s24, 4  ;;  %p1396_p0 = scmp.ne.s32.totalorder %s1670_s1, %s1395_s28  ;;  %s34_s25 = int_to_ptr.vmem [resolvable:$true] %s33_s25 }
   0x5   :  { %p1399_p1 = scmp.lt.u32.totalorder %s1395_s28, %s1670_s1 }
   0x7   :  { %p1401_p2 = pnand %p1399_p1, %p1396_p0 }
   0x9   :  { %1404 = shalt.err (!%p1401_p2)
}
   0xa   :  { %s1405_s10 = scalar_lea.vmem %s34_s25, 8192  ;;  %p1410_p4 = scmp.lt.s32.totalorder %s34_s25, %s34_s25 }
   0xb   :  { %p1406_p3 = scmp.ne.s32.totalorder %s34_s25, %s1405_s10  ;;  %p1411_p5 = scmp.lt.s32.totalorder %s1405_s10, %s1405_s10 }
   0xd   :  { %p1412_p6 = por %p1411_p5, %p1410_p4 }
   0xf   :  { %p1413_p7 = pnand %p1412_p6, %p1406_p3 }
  0x11   :  { %1416 = shalt.err (!%p1413_p7)
}
  0x12   :  { %s1514_s11 = smov 64   ;;  %s1515_s12 = smov 4  }
  0x13   :  { %39 = dma.hbm_to_vmem [thread:$0]  %s1670_s1, 8192, %s34_s25, [#allocation6], %s1514_s11, %s1514_s11, %s1515_s12  }
  0x14   :  { %s1516_s15 = smov [#allocation2]   ;;  %s1417_s19 = scalar_lea.hbm %s1669_s0, 1024 }
  0x15   :  { %s21_s16 = sshll.u32 %s1516_s15, 4  ;;  %p1418_p8 = scmp.ne.s32.totalorder %s1669_s0, %s1417_s19  ;;  %s22_s16 = int_to_ptr.vmem [resolvable:$true] %s21_s16 }
  0x16   :  { %p1421_p9 = scmp.lt.u32.totalorder %s1417_s19, %s1669_s0 }
  0x18   :  { %p1423_p10 = pnand %p1421_p9, %p1418_p8 }
  0x1a   :  { %1426 = shalt.err (!%p1423_p10)
}
  0x1b   :  { %s1427_s24 = scalar_lea.vmem %s22_s16, 1024  ;;  %p1432_p12 = scmp.lt.s32.totalorder %s22_s16, %s22_s16 }
  0x1c   :  { %p1428_p11 = scmp.ne.s32.totalorder %s22_s16, %s1427_s24  ;;  %p1433_p13 = scmp.lt.s32.totalorder %s1427_s24, %s1427_s24 }
  0x1e   :  { %p1434_p0 = por %p1433_p13, %p1432_p12 }
  0x20   :  { %p1435_p1 = pnand %p1434_p0, %p1428_p11 }
  0x22   :  { %1438 = shalt.err (!%p1435_p1)
}
  0x23   :  { %s1517_s1 = smov 512   ;;  %s1518_s25 = smov 32  }
  0x24   :  { %27 = dma.hbm_to_vmem [thread:$0]  %s1669_s0, 1024, %s22_s16, [#allocation3], %s1517_s1, %s1517_s1, %s1518_s25  }
  0x25   :  { %s1519_s28 = smov [#allocation7]   ;;  %s1520_s30 = smov [#allocation8]  }
  0x26   :  { %s47_s29 = sshll.u32 %s1519_s28, 4  ;;  %s61_s8 = sshll.u32 %s1520_s30, 4  ;;  %s48_s29 = int_to_ptr.vmem [resolvable:$true] %s47_s29  ;;  %s1593_s8 = int_to_ptr.vmem [resolvable:$true] %s61_s8 }
  0x27   :  { %s1439_s13 = scalar_lea.hbm %s1672_s3, 1024 }
  0x28   :  { %p1440_p2 = scmp.ne.s32.totalorder %s1672_s3, %s1439_s13  ;;  %p1443_p3 = scmp.lt.u32.totalorder %s1439_s13, %s1672_s3 }
  0x2a   :  { %p1445_p4 = pnand %p1443_p3, %p1440_p2 }
  0x2c   :  { %1448 = shalt.err (!%p1445_p4)
}
  0x2d   :  { %s1449_s0 = scalar_lea.vmem %s48_s29, 1024  ;;  %p1454_p6 = scmp.lt.s32.totalorder %s48_s29, %s48_s29 }
  0x2e   :  { %p1450_p5 = scmp.ne.s32.totalorder %s48_s29, %s1449_s0  ;;  %p1455_p7 = scmp.lt.s32.totalorder %s1449_s0, %s1449_s0 }
  0x30   :  { %p1456_p8 = por %p1455_p7, %p1454_p6 }
  0x32   :  { %p1457_p9 = pnand %p1456_p8, %p1450_p5 }
  0x34   :  { %1460 = shalt.err (!%p1457_p9)
}
  0x35   :  { %53 = dma.hbm_to_vmem [thread:$0]  %s1672_s3, 1024, %s48_s29, [#allocation6], %s1514_s11, %s1514_s11, %s1515_s12  }
  0x36   :  { %s1461_s22 = scalar_lea.hbm %s1674_s5, 1024 }
  0x37   :  { %p1462_p10 = scmp.ne.s32.totalorder %s1674_s5, %s1461_s22  ;;  %p1465_p11 = scmp.lt.u32.totalorder %s1461_s22, %s1674_s5 }
  0x39   :  { %p1467_p12 = pnand %p1465_p11, %p1462_p10 }
  0x3b   :  { %1470 = shalt.err (!%p1467_p12)
}
  0x3c   :  { %s1471_s26 = scalar_lea.vmem %s1593_s8, 1024  ;;  %p1476_p0 = scmp.lt.s32.totalorder %s1593_s8, %s1593_s8 }
  0x3d   :  { %p1472_p13 = scmp.ne.s32.totalorder %s1593_s8, %s1471_s26  ;;  %p1477_p1 = scmp.lt.s32.totalorder %s1471_s26, %s1471_s26 }
  0x3f   :  { %p1478_p2 = por %p1477_p1, %p1476_p0 }
  0x41   :  { %p1479_p3 = pnand %p1478_p2, %p1472_p13 }
  0x43   :  { %1482 = shalt.err (!%p1479_p3)
}
  0x44   :  { %67 = dma.hbm_to_vmem [thread:$0]  %s1674_s5, 1024, %s1593_s8, [#allocation9], %s1514_s11, %s1514_s11, %s1515_s12  }
  0x45   :  { %1505 = dma.done.wait [#allocation3], 1024  }
  0x46   :  { %1506 = vsyncadd [#allocation3], 4294966272 }
  0x47   :  { %1507 = dma.done.wait [#allocation6], 9216  }
  0x48   :  { %1508 = vsyncadd [#allocation6], 4294958080 }
  0x49   :  { %1509 = dma.done.wait [#allocation9], 1024  }
  0x4a   :  { %1510 = vsyncadd [#allocation9], 4294966272  ;;  %v1315_v0 = vld [vmem:[#allocation5 + $0x40] sm:$0xff]   ;;  %v1319_v4 = vld [vmem:[#allocation5 + $0x48] sm:$0xff]   ;;  %vm1522_vm0 = vmmov 0   ;;  %s1523_s30 = smov [#allocation10]  }
  0x4b   :  { %v1316_v1 = vld [vmem:[#allocation5 + $0xc0] sm:$0xff]   ;;  %1156 = vmatprep.subr.bf16.mxu0 %v1315_v0  ;;  %v1320_v5 = vld [vmem:[#allocation5 + $0xc8] sm:$0xff]   ;;  %v1323_v8 = vld [vmem:[#allocation5 + $0x50] sm:$0xff]   ;;  %s1051_s8 = sshll.u32 %s1523_s30, 4  ;;  %s1052_s8 = int_to_ptr.vmem [resolvable:$true] %s1051_s8 }
  0x4c   :  { %v1317_v2 = vld [vmem:[#allocation5] sm:$0xff]   ;;  %1178 = vmatprep.subr.bf16.mxu1 %v1316_v1  ;;  %v1321_v6 = vld [vmem:[#allocation5 + $0x8] sm:$0xff]   ;;  %v1324_v9 = vld [vmem:[#allocation5 + $0xd0] sm:$0xff]   ;;  %p1488_p5 = scmp.lt.s32.totalorder %s1052_s8, %s1052_s8 }
  0x4d   :  { %v1318_v3 = vld [vmem:[#allocation5 + $0x80] sm:$0xff]   ;;  %1157 = vmatpush3.bf16.msra.mxu0 %v1317_v2  ;;  %v1322_v7 = vld [vmem:[#allocation5 + $0x88] sm:$0xff]   ;;  %v1325_v10 = vld [vmem:[#allocation5 + $0x10] sm:$0xff]  }
  0x4e   :  { %1179 = vmatpush3.bf16.msra.mxu1 %v1318_v3  ;;  %1158 = vmatprep.subr.bf16.mxu0 %v1319_v4  ;;  %v1326_v11 = vld [vmem:[#allocation5 + $0x90] sm:$0xff]   ;;  %v1327_v12 = vld [vmem:[#allocation5 + $0x58] sm:$0xff]   ;;  %v1331_v16 = vld [vmem:[#allocation5 + $0x60] sm:$0xff]  }
  0x4f   :  { %1180 = vmatprep.subr.bf16.mxu1 %v1320_v5  ;;  %v1328_v13 = vld [vmem:[#allocation5 + $0xd8] sm:$0xff]   ;;  %v1332_v17 = vld [vmem:[#allocation5 + $0xe0] sm:$0xff]   ;;  %v1335_v20 = vld [vmem:[#allocation5 + $0x68] sm:$0xff]  }
  0x50   :  { %v1329_v14 = vld [vmem:[#allocation5 + $0x18] sm:$0xff]   ;;  %v1333_v18 = vld [vmem:[#allocation5 + $0x20] sm:$0xff]   ;;  %v1336_v21 = vld [vmem:[#allocation5 + $0xe8] sm:$0xff]  }
  0x51   :  { %1159 = vmatpush3.bf16.msra.mxu0 %v1321_v6  ;;  %v1330_v15 = vld [vmem:[#allocation5 + $0x98] sm:$0xff]   ;;  %v1334_v19 = vld [vmem:[#allocation5 + $0xa0] sm:$0xff]   ;;  %v1337_v22 = vld [vmem:[#allocation5 + $0x28] sm:$0xff]  }
  0x52   :  { %1181 = vmatpush3.bf16.msra.mxu1 %v1322_v7  ;;  %1160 = vmatprep.subr.bf16.mxu0 %v1323_v8  ;;  %v1338_v23 = vld [vmem:[#allocation5 + $0xa8] sm:$0xff]   ;;  %v1339_v24 = vld [vmem:[#allocation5 + $0x70] sm:$0xff]   ;;  %v1343_v28 = vld [vmem:[#allocation5 + $0x78] sm:$0xff]  }
  0x53   :  { %1182 = vmatprep.subr.bf16.mxu1 %v1324_v9  ;;  %v1340_v25 = vld [vmem:[#allocation5 + $0xf0] sm:$0xff]   ;;  %v1344_v29 = vld [vmem:[#allocation5 + $0xf8] sm:$0xff]   ;;  %v83_v32 = vld [vmem:[#allocation2] sm:$0xff] }
  0x54   :  { %v1341_v26 = vld [vmem:[#allocation5 + $0x30] sm:$0xff]   ;;  %v1345_v30 = vld [vmem:[#allocation5 + $0x38] sm:$0xff]   ;;  %v87_v33 = vld [vmem:[#allocation2 + $0x20] sm:$0xff] }
  0x55   :  { %1161 = vmatpush3.bf16.msra.mxu0 %v1325_v10  ;;  %v1342_v27 = vld [vmem:[#allocation5 + $0xb0] sm:$0xff]   ;;  %v1346_v31 = vld [vmem:[#allocation5 + $0xb8] sm:$0xff]   ;;  %v84_v34 = vld [vmem:[#allocation2 + $0x8] sm:$0xff]  ;;  %v1066_v35 = vcombine.low %v83_v32, %v87_v33  ;;  %v1067_v36 = vcombine.high %v83_v32, %v87_v33 }
  0x56   :  { %1183 = vmatpush3.bf16.msra.mxu1 %v1326_v11  ;;  %1162 = vmatprep.subr.bf16.mxu0 %v1327_v12  ;;  %v88_v37 = vld [vmem:[#allocation2 + $0x28] sm:$0xff]  ;;  %v1347_v40 = vld [vmem:[#allocation5 + $0x140] sm:$0xff]   ;;  %v1355_v48 = vld [vmem:[#allocation5 + $0x150] sm:$0xff]  }
  0x57   :  { %1184 = vmatprep.subr.bf16.mxu1 %v1328_v13  ;;  %v1068_v38 = vcombine.low %v84_v34, %v88_v37  ;;  %v1069_v39 = vcombine.high %v84_v34, %v88_v37  ;;  %682 = vmatprep.mubr.bf16.mxu0 %v1067_v36  ;;  %v1348_v41 = vld [vmem:[#allocation5 + $0x1c0] sm:$0xff]   ;;  %v1351_v44 = vld [vmem:[#allocation5 + $0x148] sm:$0xff]   ;;  %v1356_v49 = vld [vmem:[#allocation5 + $0x1d0] sm:$0xff]  }
  0x58   :  { %v1349_v42 = vld [vmem:[#allocation5 + $0x100] sm:$0xff]   ;;  %v1352_v45 = vld [vmem:[#allocation5 + $0x1c8] sm:$0xff]   ;;  %v1357_v50 = vld [vmem:[#allocation5 + $0x110] sm:$0xff]  }
  0x59   :  { %1163 = vmatpush3.bf16.msra.mxu0 %v1329_v14  ;;  %723 = vmatprep.mubr.bf16.mxu1 %v1069_v39  ;;  %v1350_v43 = vld [vmem:[#allocation5 + $0x180] sm:$0xff]   ;;  %v1353_v46 = vld [vmem:[#allocation5 + $0x108] sm:$0xff]   ;;  %v1358_v51 = vld [vmem:[#allocation5 + $0x190] sm:$0xff]  }
  0x5a   :  { %1185 = vmatpush3.bf16.msra.mxu1 %v1330_v15  ;;  %1164 = vmatprep.subr.bf16.mxu0 %v1331_v16  ;;  %v1354_v47 = vld [vmem:[#allocation5 + $0x188] sm:$0xff]   ;;  %v1359_v52 = vld [vmem:[#allocation5 + $0x158] sm:$0xff]   ;;  %v1363_v56 = vld [vmem:[#allocation5 + $0x160] sm:$0xff]  }
  0x5b   :  { %1186 = vmatprep.subr.bf16.mxu1 %v1332_v17  ;;  %v1360_v53 = vld [vmem:[#allocation5 + $0x1d8] sm:$0xff]   ;;  %v1364_v57 = vld [vmem:[#allocation5 + $0x1e0] sm:$0xff]   ;;  %v1367_v60 = vld [vmem:[#allocation5 + $0x168] sm:$0xff]   ;;  %v1521_v17 = vmov 0.0  }
  0x5c   :  { %v1361_v54 = vld [vmem:[#allocation5 + $0x118] sm:$0xff]   ;;  %v1365_v58 = vld [vmem:[#allocation5 + $0x120] sm:$0xff]   ;;  %v1368_v61 = vld [vmem:[#allocation5 + $0x1e8] sm:$0xff]  }
  0x5d   :  { %1165 = vmatpush3.bf16.msra.mxu0 %v1333_v18  ;;  %v1362_v55 = vld [vmem:[#allocation5 + $0x198] sm:$0xff]   ;;  %v1366_v59 = vld [vmem:[#allocation5 + $0x1a0] sm:$0xff]   ;;  %v1369_v62 = vld [vmem:[#allocation5 + $0x128] sm:$0xff]  }
  0x5e   :  { %1187 = vmatpush3.bf16.msra.mxu1 %v1334_v19  ;;  %1166 = vmatprep.subr.bf16.mxu0 %v1335_v20  ;;  %v1370_v63 = vld [vmem:[#allocation5 + $0x1a8] sm:$0xff]   ;;  %v1371_v0 = vld [vmem:[#allocation5 + $0x170] sm:$0xff]   ;;  %v1375_v4 = vld [vmem:[#allocation5 + $0x178] sm:$0xff]  }
  0x5f   :  { %1188 = vmatprep.subr.bf16.mxu1 %v1336_v21  ;;  %v1372_v1 = vld [vmem:[#allocation5 + $0x1f0] sm:$0xff]   ;;  %v1376_v5 = vld [vmem:[#allocation5 + $0x1f8] sm:$0xff]   ;;  %v1379_v16 = vld [vmem:[#allocation7] sm:$0xff]  }
  0x60   :  { %v1373_v2 = vld [vmem:[#allocation5 + $0x130] sm:$0xff]   ;;  %v1377_v6 = vld [vmem:[#allocation5 + $0x138] sm:$0xff]   ;;  %v1380_v18 = vld [vmem:[#allocation7 + $0x8] sm:$0xff]  }
  0x61   :  { %1167 = vmatpush3.bf16.msra.mxu0 %v1337_v22  ;;  %v1374_v3 = vld [vmem:[#allocation5 + $0x1b0] sm:$0xff]   ;;  %v1378_v7 = vld [vmem:[#allocation5 + $0x1b8] sm:$0xff]   ;;  %v1383_v21 = vld [vmem:[#allocation7 + $0x20] sm:$0xff]  }
  0x62   :  { %1189 = vmatpush3.bf16.msra.mxu1 %v1338_v23  ;;  %1168 = vmatprep.subr.bf16.mxu0 %v1339_v24  ;;  %v85_v8 = vld [vmem:[#allocation2 + $0x10] sm:$0xff]  ;;  %v86_v12 = vld [vmem:[#allocation2 + $0x18] sm:$0xff]  ;;  %v1384_v22 = vld [vmem:[#allocation7 + $0x28] sm:$0xff]  }
  0x63   :  { %1190 = vmatprep.subr.bf16.mxu1 %v1340_v25  ;;  %v89_v9 = vld [vmem:[#allocation2 + $0x30] sm:$0xff]  ;;  %v90_v13 = vld [vmem:[#allocation2 + $0x38] sm:$0xff]  ;;  %v1387_v25 = vld [vmem:[#allocation8] sm:$0xff]  }
  0x64   :  { %v1070_v10 = vcombine.low %v85_v8, %v89_v9  ;;  %v1071_v11 = vcombine.high %v85_v8, %v89_v9  ;;  %v1072_v14 = vcombine.low %v86_v12, %v90_v13  ;;  %v1073_v15 = vcombine.high %v86_v12, %v90_v13  ;;  %v1381_v19 = vld [vmem:[#allocation7 + $0x10] sm:$0xff]   ;;  %v1382_v20 = vld [vmem:[#allocation7 + $0x18] sm:$0xff]   ;;  %v1065_v33 = vld [vmem:[%s1671_s2] ss:$0 sm:$0xff] }
  0x65   :  { %1169 = vmatpush3.bf16.msra.mxu0 %v1341_v26  ;;  %v1385_v23 = vld [vmem:[#allocation7 + $0x30] sm:$0xff]   ;;  %v1386_v24 = vld [vmem:[#allocation7 + $0x38] sm:$0xff]   ;;  %v1388_v26 = vld [vmem:[#allocation8 + $0x8] sm:$0xff]  }
  0x66   :  { %1191 = vmatpush3.bf16.msra.mxu1 %v1342_v27  ;;  %1170 = vmatprep.subr.bf16.mxu0 %v1343_v28  ;;  %v1389_v27 = vld [vmem:[#allocation8 + $0x10] sm:$0xff]   ;;  %v1390_v28 = vld [vmem:[#allocation8 + $0x18] sm:$0xff]  }
  0x67   :  { %1192 = vmatprep.subr.bf16.mxu1 %v1344_v29  ;;  %v1391_v29 = vld [vmem:[#allocation8 + $0x20] sm:$0xff]  }
  0x69   :  { %1171 = vmatpush3.bf16.msra.mxu0 %v1345_v30  ;;  %v1392_v30 = vld [vmem:[#allocation8 + $0x28] sm:$0xff]  }
  0x6a   :  { %1193 = vmatpush3.bf16.msra.mxu1 %v1346_v31  ;;  %1200 = vmatprep.subr.bf16.mxu0 %v1347_v40 }
  0x6b   :  { %1222 = vmatprep.subr.bf16.mxu1 %v1348_v41 }
  0x6c   :  { %683 = vmatmul.mubr.bf16.vlgmr.msra.gmra.mrb[0].mxu0 %v1066_v35 }
  0x6d   :  { %724 = vmatmul.mubr.bf16.vlgmr.msra.gmra.mrb[0].mxu1 %v1068_v38  ;;  %1201 = vmatpush3.bf16.msra.mxu0 %v1349_v42 }
  0x6e   :  { %1223 = vmatpush3.bf16.msra.mxu1 %v1350_v43  ;;  %1202 = vmatprep.subr.bf16.mxu0 %v1351_v44 }
  0x6f   :  { %1224 = vmatprep.subr.bf16.mxu1 %v1352_v45  ;;  %764 = vmatprep.mubr.bf16.mxu0 %v1071_v11 }
  0x70   :  { %805 = vmatprep.mubr.bf16.mxu1 %v1073_v15  ;;  %v1147_v15 = vld [vmem:[%s1675_s6] ss:$0 sm:$0xff] }
  0x71   :  { %1203 = vmatpush3.bf16.msra.mxu0 %v1353_v46 }
  0x72   :  { %1225 = vmatpush3.bf16.msra.mxu1 %v1354_v47  ;;  %1204 = vmatprep.subr.bf16.mxu0 %v1355_v48 }
  0x73   :  { %1226 = vmatprep.subr.bf16.mxu1 %v1356_v49 }
  0x75   :  { %1205 = vmatpush3.bf16.msra.mxu0 %v1357_v50 }
  0x76   :  { %1227 = vmatpush3.bf16.msra.mxu1 %v1358_v51  ;;  %1206 = vmatprep.subr.bf16.mxu0 %v1359_v52 }
  0x77   :  { %1228 = vmatprep.subr.bf16.mxu1 %v1360_v53 }
  0x79   :  { %1207 = vmatpush3.bf16.msra.mxu0 %v1361_v54 }
  0x7a   :  { %1229 = vmatpush3.bf16.msra.mxu1 %v1362_v55  ;;  %1208 = vmatprep.subr.bf16.mxu0 %v1363_v56 }
  0x7b   :  { %1230 = vmatprep.subr.bf16.mxu1 %v1364_v57 }
  0x7d   :  { %1209 = vmatpush3.bf16.msra.mxu0 %v1365_v58 }
  0x7e   :  { %1231 = vmatpush3.bf16.msra.mxu1 %v1366_v59  ;;  %1210 = vmatprep.subr.bf16.mxu0 %v1367_v60 }
  0x7f   :  { %1232 = vmatprep.subr.bf16.mxu1 %v1368_v61 }
  0x81   :  { %1211 = vmatpush3.bf16.msra.mxu0 %v1369_v62 }
  0x82   :  { %1233 = vmatpush3.bf16.msra.mxu1 %v1370_v63  ;;  %1212 = vmatprep.subr.bf16.mxu0 %v1371_v0 }
  0x83   :  { %1234 = vmatprep.subr.bf16.mxu1 %v1372_v1 }
  0x85   :  { %1213 = vmatpush3.bf16.msra.mxu0 %v1373_v2 }
  0x86   :  { %1235 = vmatpush3.bf16.msra.mxu1 %v1374_v3  ;;  %1214 = vmatprep.subr.bf16.mxu0 %v1375_v4  ;;  %v1393_v3 = vld [vmem:[#allocation8 + $0x30] sm:$0xff]   ;;  %v1394_v4 = vld [vmem:[#allocation8 + $0x38] sm:$0xff]  }
  0x87   :  { %1236 = vmatprep.subr.bf16.mxu1 %v1376_v5  ;;  %v1138_v5 = vld [vmem:[%s1673_s4] ss:$0 sm:$0xff]  ;;  %s1483_s4 = scalar_lea.vmem %s1052_s8, 256 }
  0x88   :  { %p1484_p4 = scmp.ne.s32.totalorder %s1052_s8, %s1483_s4  ;;  %p1489_p6 = scmp.lt.s32.totalorder %s1483_s4, %s1483_s4 }
  0x89   :  { %1215 = vmatpush3.bf16.msra.mxu0 %v1377_v6 }
  0x8a   :  { %1237 = vmatpush3.bf16.msra.mxu1 %v1378_v7  ;;  %1262 = vmatprep.subr.bf16.mxu0 %v1521_v17  ;;  %p1490_p7 = por %p1489_p6, %p1488_p5 }
  0x8b   :  { %1282 = vmatprep.subr.bf16.mxu1 %v1521_v17 }
  0x8c   :  { %765 = vmatmul.mubr.bf16.vlgmr.msra.gmra.mrb[4].mxu0 %v1070_v10  ;;  %p1491_p8 = pnand %p1490_p7, %p1484_p4 }
  0x8d   :  { %806 = vmatmul.mubr.bf16.vlgmr.msra.gmra.mrb[4].mxu1 %v1072_v14  ;;  %1263 = vmatpush3.bf16.msra.mxu0 %v1379_v16 }
  0x8e   :  { %1264 = vmatprep.subr.bf16.mxu0 %v1521_v17  ;;  %1278 = vmatprep.mubr.msk.bf16.mxu0 %vm1522_vm0, %v1521_v17 }
  0x8f   :  { %1298 = vmatprep.mubr.msk.bf16.mxu1 %vm1522_vm0, %v1521_v17  ;;  %1283 = vmatpush3.bf16.msra.mxu1 %v1387_v25 }
  0x90   :  { %1284 = vmatprep.subr.bf16.mxu1 %v1521_v17 }
  0x91   :  { %1265 = vmatpush3.bf16.msra.mxu0 %v1380_v18 }
  0x92   :  { %1266 = vmatprep.subr.bf16.mxu0 %v1521_v17 }
  0x93   :  { %1285 = vmatpush3.bf16.msra.mxu1 %v1388_v26 }
  0x94   :  { %1286 = vmatprep.subr.bf16.mxu1 %v1521_v17 }
  0x95   :  { %1267 = vmatpush3.bf16.msra.mxu0 %v1381_v19 }
  0x96   :  { %1268 = vmatprep.subr.bf16.mxu0 %v1521_v17 }
  0x97   :  { %1287 = vmatpush3.bf16.msra.mxu1 %v1389_v27 }
  0x98   :  { %1288 = vmatprep.subr.bf16.mxu1 %v1521_v17 }
  0x99   :  { %1269 = vmatpush3.bf16.msra.mxu0 %v1382_v20 }
  0x9a   :  { %1270 = vmatprep.subr.bf16.mxu0 %v1521_v17 }
  0x9b   :  { %1289 = vmatpush3.bf16.msra.mxu1 %v1390_v28 }
  0x9c   :  { %1290 = vmatprep.subr.bf16.mxu1 %v1521_v17 }
  0x9d   :  { %1271 = vmatpush3.bf16.msra.mxu0 %v1383_v21 }
  0x9e   :  { %1272 = vmatprep.subr.bf16.mxu0 %v1521_v17 }
  0x9f   :  { %1291 = vmatpush3.bf16.msra.mxu1 %v1391_v29 }
  0xa0   :  { %1292 = vmatprep.subr.bf16.mxu1 %v1521_v17 }
  0xa1   :  { %1273 = vmatpush3.bf16.msra.mxu0 %v1384_v22 }
  0xa2   :  { %1274 = vmatprep.subr.bf16.mxu0 %v1521_v17 }
  0xa3   :  { %1293 = vmatpush3.bf16.msra.mxu1 %v1392_v30 }
  0xa4   :  { %1294 = vmatprep.subr.bf16.mxu1 %v1521_v17 }
  0xa5   :  { %1275 = vmatpush3.bf16.msra.mxu0 %v1385_v23 }
  0xa6   :  { %1276 = vmatprep.subr.bf16.mxu0 %v1521_v17 }
  0xa7   :  { %1295 = vmatpush3.bf16.msra.mxu1 %v1393_v3 }
  0xa8   :  { %1296 = vmatprep.subr.bf16.mxu1 %v1521_v17 }
  0xa9   :  { %1277 = vmatpush3.bf16.msra.mxu0 %v1386_v24 }
  0xab   :  { %1297 = vmatpush3.bf16.msra.mxu1 %v1394_v4 }
 0x13f   :  { %v1172_v31 = vpop.f32.mrb[0].mxu0 }
 0x140   :  { %v1194_v32 = vpop.f32.mrb[0].mxu1  ;;  %v1173_v34 = vpop.f32.mrb[1].mxu0 }
 0x141   :  { %v1174_v35 = vadd.f32 %v1173_v34, %v1172_v31  ;;  %v1195_v36 = vpop.f32.mrb[1].mxu1  ;;  %v1175_v37 = vpop.f32.mrb[2].mxu0 }
 0x142   :  { %v1196_v38 = vadd.f32 %v1195_v36, %v1194_v32  ;;  %v1197_v39 = vpop.f32.mrb[2].mxu1  ;;  %v1176_v40 = vpop.f32.mrb[3].mxu0 }
 0x143   :  { %v685_v41 = vadd.f32 %v1174_v35, %v1065_v33  ;;  %v1177_v42 = vadd.f32 %v1176_v40, %v1175_v37  ;;  %v1198_v43 = vpop.f32.mrb[3].mxu1 }
 0x144   :  { %v1199_v44 = vadd.f32 %v1198_v43, %v1197_v39 }
 0x145   :  { %v726_v45 = vadd.f32 %v1196_v38, %v685_v41  ;;  %v688_v46 = vadd.f32 %v1177_v42, %v1065_v33 }
 0x147   :  { %v729_v47 = vadd.f32 %v1199_v44, %v688_v46 }
 0x15f   :  { %v1216_v48 = vpop.f32.mrb[4].mxu0 }
 0x160   :  { %v1238_v49 = vpop.f32.mrb[4].mxu1  ;;  %v1217_v50 = vpop.f32.mrb[5].mxu0 }
 0x161   :  { %v1218_v51 = vadd.f32 %v1217_v50, %v1216_v48  ;;  %v1239_v52 = vpop.f32.mrb[5].mxu1  ;;  %v1219_v53 = vpop.f32.mrb[6].mxu0 }
 0x162   :  { %v1240_v54 = vadd.f32 %v1239_v52, %v1238_v49  ;;  %v1241_v55 = vpop.f32.mrb[6].mxu1  ;;  %v1220_v56 = vpop.f32.mrb[7].mxu0 }
 0x163   :  { %v767_v57 = vadd.f32 %v1218_v51, %v726_v45  ;;  %v1221_v58 = vadd.f32 %v1220_v56, %v1219_v53  ;;  %v1242_v59 = vpop.f32.mrb[7].mxu1 }
 0x164   :  { %v1243_v60 = vadd.f32 %v1242_v59, %v1241_v55 }
 0x165   :  { %v808_v61 = vadd.f32 %v1240_v54, %v767_v57  ;;  %v770_v62 = vadd.f32 %v1221_v58, %v729_v47 }
 0x167   :  { %v811_v63 = vadd.f32 %v1243_v60, %v770_v62  ;;  %v814_v0 = vmax.f32 %v808_v61, 0.0 }
 0x169   :  { %v815_v1 = vmax.f32 %v811_v63, 0.0 }
 0x16b   :  { %v816_v2 = vpack.c.bf16 %v815_v1, %v814_v0 }
 0x16d   :  { %1279 = vmatmul.mubr.bf16.vlgmr.msra.gmra.mrb[8].mxu0 %v816_v2 }
 0x240   :  { %v922_v6 = vpop.f32.mrb[8].mxu0 }
 0x241   :  { %v923_v7 = vadd.f32 %v1138_v5, %v922_v6  ;;  %v1280_v8 = vpop.f32.mrb[9].mxu0 }
 0x242   :  { %v925_v9 = vpop.f32.mrb[10].mxu0 }
 0x243   :  { %v926_v10 = vadd.f32 %v1138_v5, %v925_v9  ;;  %v1281_v11 = vpop.f32.mrb[11].mxu0  ;;  %v929_v12 = vmax.f32 %v923_v7, 0.0 }
 0x245   :  { %v930_v13 = vmax.f32 %v926_v10, 0.0 }
 0x247   :  { %v931_v14 = vpack.c.bf16 %v930_v13, %v929_v12 }
 0x249   :  { %1299 = vmatmul.mubr.bf16.vlgmr.msra.gmra.mrb[8].mxu1 %v931_v14 }
 0x31c   :  { %v1037_v16 = vpop.f32.mrb[8].mxu1 }
 0x31d   :  { %v1038_v17 = vadd.f32 %v1147_v15, %v1037_v16  ;;  %v1300_v18 = vpop.f32.mrb[9].mxu1 }
 0x31e   :  { %v1040_v19 = vpop.f32.mrb[10].mxu1 }
 0x31f   :  { %1044 = vst [vmem:[#allocation10] sm:$0xff] %v1038_v17  ;;  %v1041_v20 = vadd.f32 %v1147_v15, %v1040_v19  ;;  %v1301_v21 = vpop.f32.mrb[11].mxu1 }
 0x321   :  { %1045 = vst [vmem:[#allocation10 + $0x8] sm:$0xff] %v1041_v20 }
 0x322   :  { %1494 = shalt.err (!%p1491_p8)
}
 0x323   :  { %s1495_s10 = scalar_lea.hbm %s1676_s7, 256 }
 0x324   :  { %p1496_p9 = scmp.ne.s32.totalorder %s1676_s7, %s1495_s10  ;;  %p1499_p10 = scmp.lt.u32.totalorder %s1495_s10, %s1676_s7 }
 0x326   :  { %p1501_p11 = pnand %p1499_p10, %p1496_p9 }
 0x328   :  { %1504 = shalt.err (!%p1501_p11)
}
 0x329   :  { %s1524_s18 = smov 128   ;;  %s1525_s0 = smov 8  }
 0x32a   :  { %1057 = dma.vmem_to_hbm [thread:$0]  %s1052_s8, 256, %s1676_s7, [#allocation4], %s1524_s18, %s1524_s18, %s1525_s0  }
 0x32b   :  { %1511 = dma.done.wait [#allocation4], 256  }
 0x32c   :  { %1512 = vsyncadd [#allocation4], 4294967040 }
 0x32d   :  { %1061 = vsyncpa [#allocation3], 1 }
 0x32e   :  { %1062 = vsyncpa [#allocation6], 1 }
 0x32f   :  { %1063 = vsyncpa [#allocation9], 1 }
 0x330   :  { %1064 = vsyncpa [#allocation4], 1 }

</bundles_post_ra>
